<compile_context>
chip_gen: v7x
topology: tpu7x:2x2x1
jax: 0.10.0
libtpu: 0.0.40
codegen_flags: <defaults>
</compile_context>

<pallas_src>
import functools

import jax
import jax.numpy as jnp
from jax.experimental import pallas as pl
from jax.experimental.pallas import tpu as pltpu


def _round_up(v, m):
    return (v + m - 1) // m * m


# ---------------------------------------------------------------------------
# Pass 1: single matmul per tile + packed per-tile channel sum / sum-of-squares
#         (partials only -> grid stays fully "parallel"; reduction is glue).
# ---------------------------------------------------------------------------
def _stats_kernel(xcol_ref, w_ref, stat_ref, *, cp):
    # xcol_ref: (TM, KKC) bf16 ; w_ref: (KKC, CP) bf16 ; stat_ref: (1, 1, 2*CP) f32
    y = jnp.dot(xcol_ref[...], w_ref[...], preferred_element_type=jnp.float32)
    s = jnp.sum(y, axis=0, keepdims=True)          # (1, CP)
    q = jnp.sum(y * y, axis=0, keepdims=True)      # (1, CP)
    stat_ref[...] = jnp.concatenate([s, q], axis=-1)[None]   # (1, 1, 2*CP)


# ---------------------------------------------------------------------------
# Pass 2: recompute conv tile (single matmul), fused BN (scale/shift) + ReLU.
# ---------------------------------------------------------------------------
def _bn_relu_kernel(xcol_ref, w_ref, scale_ref, shift_ref, o_ref, *, cout):
    y = jnp.dot(xcol_ref[...], w_ref[...], preferred_element_type=jnp.float32)
    y = y * scale_ref[...] + shift_ref[...]
    # NOTE: the store is lane-masked when Cout < 128 and dense for Cout >= 128.
    # TODO(synk): for small Cout, pack the tile into a (1, TM*Cout) lane-dense
    # row (reshape in glue) once the (TM, Cout)->(1, TM*Cout) Mosaic relayout
    # is verified on all target generations.
    o_ref[...] = jnp.maximum(y[:, :cout], 0.0)


# ---------------------------------------------------------------------------
# Wrapper: Conv2d + BatchNorm2d(training, gamma=1, beta=0) + ReLU
# ---------------------------------------------------------------------------
def conv_bn_relu(x, w, b=None, *, stride=2, padding=1, eps=1e-5):
    """x: (N, Cin, H, W) NCHW; w: (Cout, Cin, K, K); b: (Cout,) (cancels under batch-stat BN)."""
    del b  # per-channel bias cancels exactly under batch-statistics BatchNorm.

    N, Cin, H, W = x.shape
    Cout = w.shape[0]
    K = w.shape[2]
    S, P = stride, padding
    OH = (H + 2 * P - K) // S + 1
    OW = (W + 2 * P - K) // S + 1
    M = N * OH * OW
    KKC = K * K * Cin
    CP = _round_up(Cout, 128)

    # ---- glue: lane-dense im2col patch slab (bf16) -------------------------
    x_nhwc = jnp.transpose(x, (0, 2, 3, 1))
    xp = jnp.pad(x_nhwc, ((0, 0), (P, P), (P, P), (0, 0)))
    taps = [
        xp[:, kh:kh + S * (OH - 1) + 1:S, kw:kw + S * (OW - 1) + 1:S, :]
        for kh in range(K) for kw in range(K)
    ]  # each (N, OH, OW, Cin)
    xcol = jnp.stack(taps, axis=3).reshape(M, KKC).astype(jnp.bfloat16)

    # weights as one (KKC, CP) matmul operand; Cout zero-padded to 128 lanes.
    wm = jnp.transpose(w, (2, 3, 1, 0)).reshape(KKC, Cout)
    wm = jnp.pad(wm, ((0, 0), (0, CP - Cout))).astype(jnp.bfloat16)

    # ---- tile size from chip VMEM budget ------------------------------------
    try:
        vmem_cap = pltpu.get_tpu_info().vmem_capacity_bytes
    except Exception:
        vmem_cap = 64 * 1024 * 1024  # conservative (v7x per-core) fallback
    vmem_limit = int(min(vmem_cap * 3 // 4, 96 * 1024 * 1024))

    fixed = 2 * KKC * CP * 2 + 8 * CP * 4                 # resident weights + small blocks
    per_row = 2 * KKC * 2 + 2 * Cout * 4 + CP * 4         # dbl-buf in + dbl-buf out + f32 y
    tm_budget = max(8, (vmem_limit // 2 - fixed) // per_row)
    TM = int(min(2048, (tm_budget // 8) * 8))
    TM = max(8, TM)
    Mp8 = _round_up(M, 8)
    if Mp8 < 2 * TM:                                      # keep >= 2 grid steps (megacore)
        TM = max(8, _round_up((Mp8 + 1) // 2, 8))
    GM = -(-M // TM)
    TM = max(8, _round_up(-(-M // GM), 8))                # rebalance -> minimal padding
    Mp = GM * TM
    xcol = jnp.pad(xcol, ((0, Mp - M), (0, 0)))           # zero rows -> zero conv -> exact stats

    grid = (GM,)
    xcol_spec = pl.BlockSpec((TM, KKC), lambda i: (i, 0))
    w_spec = pl.BlockSpec((KKC, CP), lambda i: (0, 0))
    cparams = pltpu.CompilerParams(
        dimension_semantics=("parallel",),
        vmem_limit_bytes=vmem_limit,
    )

    # ---- pass 1: packed per-tile channel statistics partials ----------------
    stats = pl.pallas_call(
        functools.partial(_stats_kernel, cp=CP),
        out_shape=jax.ShapeDtypeStruct((GM, 1, 2 * CP), jnp.float32),
        grid=grid,
        in_specs=[xcol_spec, w_spec],
        out_specs=pl.BlockSpec((1, 1, 2 * CP), lambda i: (i, 0, 0)),
        compiler_params=cparams,
    )(xcol, wm)

    # ---- glue: tiny reduction -> batch statistics (training-mode BN) --------
    tot = jnp.sum(stats[:, 0, :], axis=0)                 # (2*CP,)
    mean = tot[:CP] / float(M)
    # NOTE: E[y^2]-E[y]^2 in f32, clamped >= 0 (cancellation safety); adequate
    # for BN here.  Chan-style (mean, M2) partials would be more robust.
    var = jnp.maximum(tot[CP:] / float(M) - mean * mean, 0.0)
    inv = jax.lax.rsqrt(var + eps)                        # gamma=1, beta=0
    scale = inv.reshape(1, CP)
    shift = (-mean * inv).reshape(1, CP)

    # ---- pass 2: recompute conv, fused BN + ReLU, write final output --------
    # Recompute is cheaper than a y round-trip here (KKC bf16 bytes/row << 2*CP).
    # TODO(synk): for large-Cin layers (K*K*Cin >= CP) store y as bf16 in pass 1
    # and make pass 2 a pure VPU read instead of re-running the matmul.
    out2d = pl.pallas_call(
        functools.partial(_bn_relu_kernel, cout=Cout),
        out_shape=jax.ShapeDtypeStruct((Mp, Cout), jnp.float32),
        grid=grid,
        in_specs=[
            xcol_spec,
            w_spec,
            pl.BlockSpec((1, CP), lambda i: (0, 0)),
            pl.BlockSpec((1, CP), lambda i: (0, 0)),
        ],
        out_specs=pl.BlockSpec((TM, Cout), lambda i: (i, 0)),
        compiler_params=cparams,
    )(xcol, wm, scale, shift)

    # ---- glue: back to NCHW --------------------------------------------------
    return out2d[:M].reshape(N, OH, OW, Cout).transpose(0, 3, 1, 2)


def reference(x, w, b, *, stride=2, padding=1, eps=1e-5):
    conv = jax.lax.conv_general_dilated(
        x, w, window_strides=(stride, stride),
        padding=((padding, padding), (padding, padding)),
        dimension_numbers=("NCHW", "OIHW", "NCHW"),
    ) + b[None, :, None, None]
    mean = conv.mean(axis=(0, 2, 3), keepdims=True)
    var = conv.var(axis=(0, 2, 3), keepdims=True)   # biased, as in BN training
    return jnp.maximum((conv - mean) / jnp.sqrt(var + eps), 0.0)


if __name__ == "__main__":
    # Module config: Conv(in_channel=4, out_channel=8, kernel_size=3, stride=2, padding=1)
    N, Cin, H, W = 2, 4, 16, 16
    Cout, K, S, P = 8, 3, 2, 1

    key = jax.random.PRNGKey(0)
    kx, kw = jax.random.split(key)
    x = jax.random.normal(kx, (N, Cin, H, W), dtype=jnp.float32)

    # nn.init.xavier_uniform_ on (Cout, Cin, K, K); bias zeros.
    fan_in, fan_out = Cin * K * K, Cout * K * K
    bound = (6.0 / (fan_in + fan_out)) ** 0.5
    w = jax.random.uniform(kw, (Cout, Cin, K, K), minval=-bound, maxval=bound,
                           dtype=jnp.float32)
    b = jnp.zeros((Cout,), dtype=jnp.float32)

    out = jax.block_until_ready(
        jax.jit(functools.partial(conv_bn_relu, stride=S, padding=P))(x, w, b)
    )
    ref = reference(x, w, b, stride=S, padding=P)

    assert out.shape == (N, Cout, H // 2, W // 2), out.shape
    err = float(jnp.max(jnp.abs(out - ref)))
    assert jnp.allclose(out, ref, atol=2e-2, rtol=2e-2), err
    print("KERNEL_OK")
</pallas_src>

<mosaic_0001>
module attributes {stable_mosaic.version = 11 : i64} {
  func.func @_stats_kernel(%arg0: i32, %arg1: memref<64x36xbf16, #tpu.memory_space<vmem>>, %arg2: memref<36x128xbf16, #tpu.memory_space<vmem>>, %arg3: memref<1x1x256xf32, #tpu.memory_space<vmem>>) attributes {dimension_semantics = [#tpu.dimension_semantics<parallel>], iteration_bounds = array<i64: 2>, scalar_prefetch = 0 : i64, scratch_operands = 0 : i64, tpu.core_type = #tpu.core_type<tc>, window_params = [{transform_indices = @transform_0, window_bounds = array<i64: 64, 36>}, {pipeline_mode = #tpu.pipeline_mode<synchronous>, transform_indices = @transform_1, window_bounds = array<i64: 36, 128>}, {transform_indices = @transform_2, window_bounds = array<i64: 1, 1, 256>}]} {
    %c0 = arith.constant 0 : index
    %c0_0 = arith.constant 0 : index
    %0 = vector.load %arg1[%c0, %c0_0] : memref<64x36xbf16, #tpu.memory_space<vmem>>, vector<64x36xbf16>
    %c0_1 = arith.constant 0 : index
    %c0_2 = arith.constant 0 : index
    %1 = vector.load %arg2[%c0_1, %c0_2] : memref<36x128xbf16, #tpu.memory_space<vmem>>, vector<36x128xbf16>
    %cst = arith.constant dense<0.000000e+00> : vector<64x128xf32>
    %2 = tpu.matmul %0, %1, %cst {dimension_numbers = #tpu.dot_dimension_numbers<[1], [0], [0], [1], [0, 0, 1, 1], [], []>} : vector<64x36xbf16>, vector<36x128xbf16>, vector<64x128xf32> -> vector<64x128xf32>
    %cst_3 = arith.constant dense<0.000000e+00> : vector<128xf32>
    %3 = vector.multi_reduction <add>, %2, %cst_3 [0] : vector<64x128xf32> to vector<128xf32>
    %4 = vector.shape_cast %3 : vector<128xf32> to vector<1x128xf32>
    %5 = arith.mulf %2, %2 : vector<64x128xf32>
    %cst_4 = arith.constant dense<0.000000e+00> : vector<128xf32>
    %6 = vector.multi_reduction <add>, %5, %cst_4 [0] : vector<64x128xf32> to vector<128xf32>
    %7 = vector.shape_cast %6 : vector<128xf32> to vector<1x128xf32>
    %8 = tpu.concatenate %4, %7 in 1 : vector<1x128xf32>, vector<1x128xf32> -> vector<1x256xf32>
    %9 = vector.shape_cast %8 : vector<1x256xf32> to vector<1x1x256xf32>
    %c0_5 = arith.constant 0 : index
    %c0_6 = arith.constant 0 : index
    %c0_7 = arith.constant 0 : index
    %10 = vector.load %arg3[%c0_5, %c0_6, %c0_7] : memref<1x1x256xf32, #tpu.memory_space<vmem>>, vector<1x1x256xf32>
    tpu.vector_store %arg3[%c0_5, %c0_6, %c0_7], %9 {strides = array<i32>} : memref<1x1x256xf32, #tpu.memory_space<vmem>>, vector<1x1x256xf32>,
    return
  }
  func.func @transform_0(%arg0: i32) -> (i32, i32) {
    %c0_i32 = arith.constant 0 : i32
    %c0_i32_0 = arith.constant 0 : i32
    return %arg0, %c0_i32 : i32, i32
  }
  func.func @transform_1(%arg0: i32) -> (i32, i32) {
    %c0_i32 = arith.constant 0 : i32
    %c0_i32_0 = arith.constant 0 : i32
    %c0_i32_1 = arith.constant 0 : i32
    return %c0_i32, %c0_i32_0 : i32, i32
  }
  func.func @transform_2(%arg0: i32) -> (i32, i32, i32) {
    %c0_i32 = arith.constant 0 : i32
    %c0_i32_0 = arith.constant 0 : i32
    %c0_i32_1 = arith.constant 0 : i32
    return %arg0, %c0_i32, %c0_i32_0 : i32, i32, i32
  }
}

module attributes {stable_mosaic.version = 11 : i64} {
  func.func @_bn_relu_kernel(%arg0: i32, %arg1: memref<64x36xbf16, #tpu.memory_space<vmem>>, %arg2: memref<36x128xbf16, #tpu.memory_space<vmem>>, %arg3: memref<1x128xf32, #tpu.memory_space<vmem>>, %arg4: memref<1x128xf32, #tpu.memory_space<vmem>>, %arg5: memref<64x8xf32, #tpu.memory_space<vmem>>) attributes {dimension_semantics = [#tpu.dimension_semantics<parallel>], iteration_bounds = array<i64: 2>, scalar_prefetch = 0 : i64, scratch_operands = 0 : i64, tpu.core_type = #tpu.core_type<tc>, window_params = [{transform_indices = @transform_0, window_bounds = array<i64: 64, 36>}, {pipeline_mode = #tpu.pipeline_mode<synchronous>, transform_indices = @transform_1, window_bounds = array<i64: 36, 128>}, {pipeline_mode = #tpu.pipeline_mode<synchronous>, transform_indices = @transform_2, window_bounds = array<i64: 1, 128>}, {pipeline_mode = #tpu.pipeline_mode<synchronous>, transform_indices = @transform_3, window_bounds = array<i64: 1, 128>}, {transform_indices = @transform_4, window_bounds = array<i64: 64, 8>}]} {
    %c0 = arith.constant 0 : index
    %c0_0 = arith.constant 0 : index
    %0 = vector.load %arg1[%c0, %c0_0] : memref<64x36xbf16, #tpu.memory_space<vmem>>, vector<64x36xbf16>
    %c0_1 = arith.constant 0 : index
    %c0_2 = arith.constant 0 : index
    %1 = vector.load %arg2[%c0_1, %c0_2] : memref<36x128xbf16, #tpu.memory_space<vmem>>, vector<36x128xbf16>
    %cst = arith.constant dense<0.000000e+00> : vector<64x128xf32>
    %2 = tpu.matmul %0, %1, %cst {dimension_numbers = #tpu.dot_dimension_numbers<[1], [0], [0], [1], [0, 0, 1, 1], [], []>} : vector<64x36xbf16>, vector<36x128xbf16>, vector<64x128xf32> -> vector<64x128xf32>
    %c0_3 = arith.constant 0 : index
    %c0_4 = arith.constant 0 : index
    %3 = vector.load %arg3[%c0_3, %c0_4] : memref<1x128xf32, #tpu.memory_space<vmem>>, vector<1x128xf32>
    %4 = vector.broadcast %3 : vector<1x128xf32> to vector<64x128xf32>
    %5 = arith.mulf %2, %4 : vector<64x128xf32>
    %c0_5 = arith.constant 0 : index
    %c0_6 = arith.constant 0 : index
    %6 = vector.load %arg4[%c0_5, %c0_6] : memref<1x128xf32, #tpu.memory_space<vmem>>, vector<1x128xf32>
    %7 = vector.broadcast %6 : vector<1x128xf32> to vector<64x128xf32>
    %8 = arith.addf %5, %7 : vector<64x128xf32>
    %9 = vector.extract_strided_slice %8 {offsets = [0, 0], sizes = [64, 8], strides = [1, 1]} : vector<64x128xf32> to vector<64x8xf32>
    %cst_7 = arith.constant 0.000000e+00 : f32
    %10 = vector.broadcast %cst_7 : f32 to vector<64x8xf32>
    %11 = arith.maximumf %9, %10 : vector<64x8xf32>
    %c0_8 = arith.constant 0 : index
    %c0_9 = arith.constant 0 : index
    %12 = vector.load %arg5[%c0_8, %c0_9] : memref<64x8xf32, #tpu.memory_space<vmem>>, vector<64x8xf32>
    tpu.vector_store %arg5[%c0_8, %c0_9], %11 {strides = array<i32>} : memref<64x8xf32, #tpu.memory_space<vmem>>, vector<64x8xf32>,
    return
  }
  func.func @transform_0(%arg0: i32) -> (i32, i32) {
    %c0_i32 = arith.constant 0 : i32
    %c0_i32_0 = arith.constant 0 : i32
    return %arg0, %c0_i32 : i32, i32
  }
  func.func @transform_1(%arg0: i32) -> (i32, i32) {
    %c0_i32 = arith.constant 0 : i32
    %c0_i32_0 = arith.constant 0 : i32
    %c0_i32_1 = arith.constant 0 : i32
    return %c0_i32, %c0_i32_0 : i32, i32
  }
  func.func @transform_2(%arg0: i32) -> (i32, i32) {
    %c0_i32 = arith.constant 0 : i32
    %c0_i32_0 = arith.constant 0 : i32
    %c0_i32_1 = arith.constant 0 : i32
    return %c0_i32, %c0_i32_0 : i32, i32
  }
  func.func @transform_3(%arg0: i32) -> (i32, i32) {
    %c0_i32 = arith.constant 0 : i32
    %c0_i32_0 = arith.constant 0 : i32
    %c0_i32_1 = arith.constant 0 : i32
    return %c0_i32, %c0_i32_0 : i32, i32
  }
  func.func @transform_4(%arg0: i32) -> (i32, i32) {
    %c0_i32 = arith.constant 0 : i32
    %c0_i32_0 = arith.constant 0 : i32
    return %arg0, %c0_i32 : i32, i32
  }
}

</mosaic_0001>

<bundles_post_ra>
// kernel: conv_bn_relu.2
= control target key start
LH: loop header
LB: loop body
LE: loop exit
PB: predicated region body
PF: predicated region fallthrough
CT: control target
= control target key end

     0   :  { %s475_s9 = smov 0   ;;  %s506_s0 = inlined_call_operand.vmem [shape: bf16[128,36], index: 0, kind: input, shape index: {}]   ;;  %s507_s1 = inlined_call_operand.vmem [shape: bf16[36,128], index: 1, kind: input, shape index: {}]   ;;  %s508_s2 = inlined_call_operand.vmem [shape: f32[2,1,256], index: 2, kind: output, shape index: {}]  }
   0x1 LB: > { %s481_s10 = sadd.s32 4294967295, %s457_s9   ;;  %p389_p0 = scmp.ge.s32.totalorder %s457_s9, 1  ;;  %s457_s9 = sphi %s475_s9, %s12_s9  }
   0x2   : > { %p113_p1 = scmp.lt.s32.totalorder %s457_s9, 3 }
   0x4   : > { %p114_p2 = pnand %p389_p0, %p113_p1 }
   0x5   : > { %v444_v0 = vld [vmem:[%s507_s1] sm:$0xff] (!%p114_p2)   ;;  %v445_v1 = vld [vmem:[%s507_s1 + $0x8] sm:$0xff] (!%p114_p2)   ;;  %s390_s15 = sshll.u32 (!%p114_p2), %s481_s10, 3  ;;  %v446_v2 = vld [vmem:[%s507_s1 + $0x10] ss:$0 sps:$4 sm:$0x33] (!%p114_p2)   ;;  %v315_v45 = vlaneseq (!%p114_p2) }
   0x6   : > { %117 = sbr.rel (%p114_p2) target bundleno = 268 (0x10c), region = 28  ;;  %413 = vmatprep.subr.bf16.mxu0 (!%p114_p2), %v444_v0  ;;  %427 = vmatprep.subr.bf16.mxu1 (!%p114_p2), %v444_v0  ;;  %p135_p3 = scmp.lt.s32.totalorder (!%p114_p2), %s390_s15, 15  ;;  %vm206_vm0 = vcmask (!%p114_p2), 1041408   ;;  %vm193_vm1 = vcmask (!%p114_p2), 293888   ;;  %v459_v43 = vmov (!%p114_p2), 1966171168  }
   0x7   : > { %414 = vmatpush3.bf16.msra.mxu0 (!%p114_p2), %v444_v0  ;;  %430 = vmatpush3.bf16.msra.mxu1 (!%p114_p2), %v444_v0  ;;  %v208_v3 = vsel (!%p114_p2), %vm206_vm0, %v446_v2, 0  ;;  %v313_v44 = vunpack.c.l.s4 (!%p114_p2), %v459_v43  ;;  %p140_p4 = scmp.lt.s32.totalorder (!%p114_p2), %s481_s10, 1  ;;  %v316_v51 = vshrl.u32 (!%p114_p2), %v315_v45, 7  ;;  %vm329_vm2 = vcmp.lt.s32.totalorder (!%p114_p2), %v315_v45, 256 }
   0x8   : > { %415 = vmatprep.subr.bf16.mxu0 (!%p114_p2), %v445_v1  ;;  %428 = vmatprep.subr.bf16.mxu1 (!%p114_p2), %v445_v1 }
   0x9   : > { %v314_v50 = vunpack.c.0.s8 (!%p114_p2), %v313_v44 }
   0xb   : > { %416 = vmatpush3.bf16.msra.mxu0 (!%p114_p2), %v445_v1  ;;  %431 = vmatpush3.bf16.msra.mxu1 (!%p114_p2), %v445_v1  ;;  %v317_v55 = vsub.s32 (!%p114_p2), %v314_v50, %v316_v51 }
   0xc   : > { %433 = vmatprep.subr.msk.bf16.mxu0 (!%p114_p2), %vm206_vm0, %v446_v2  ;;  %434 = vmatprep.subr.msk.bf16.mxu1 (!%p114_p2), %vm206_vm0, %v446_v2 }
   0xd   : > { %s510_s15 = smov (!%p135_p3, %s390_s15), 15  ;;  %s512_s10 = smov (!%p140_p4, %s481_s10), 1 }
   0xe   : > { %s391_s18 = sshll.u32 %s510_s15, 2  ;;  %s392_s22 = sshll.u32 %s512_s10, 1 }
   0xf   : > { %s138_s21 = scalar_lea.vmem %s506_s0, %s391_s18  ;;  %418 = vmatpush3.bf16.msra.mxu0 %v208_v3  ;;  %432 = vmatpush3.bf16.msra.mxu1 %v208_v3  ;;  %s143_s25 = scalar_lea.vmem %s508_s2, %s392_s22 }
  0x10   : > { %v447_v4 = vld [vmem:[%s138_s21] sm:$0xff]   ;;  %v448_v5 = vld [vmem:[%s138_s21 + $0x8] sm:$0xff]   ;;  %v449_v6 = vld [vmem:[%s138_s21 + $0x10] sm:$0xff]  }
  0x11   : > { %419 = vmatprep.mubr.msk.bf16.mxu0 %vm193_vm1, %v447_v4  ;;  %v450_v7 = vld [vmem:[%s138_s21 + $0x18] sm:$0xff]   ;;  %423 = vmatprep.mubr.msk.bf16.mxu1 %vm193_vm1, %v449_v6 }
  0x12   : > { %420 = vmatmul.mubr.msk.bf16.vlgmr.msra.gmra.mrb[0].mxu0 %vm193_vm1, %v448_v5  ;;  %424 = vmatmul.mubr.msk.bf16.vlgmr.msra.gmra.mrb[0].mxu1 %vm193_vm1, %v450_v7 }
  0xe5   : > { %v421_v8 = vpop.f32.mrb[0].mxu0  ;;  %v425_v9 = vpop.f32.mrb[0].mxu1 }
  0xe6   : > { %v244_v10 = vpop.f32.mrb[1].mxu0  ;;  %v260_v11 = vpop.f32.mrb[1].mxu1  ;;  %v290_v19 = vmul.f32 %v421_v8, %v421_v8  ;;  %v294_v31 = vmul.f32 %v425_v9, %v425_v9 }
  0xe7   : > { %v422_v12 = vpop.f32.mrb[2].mxu0  ;;  %v426_v13 = vpop.f32.mrb[2].mxu1  ;;  %v288_v16 = vmul.f32 %v244_v10, %v244_v10  ;;  %v292_v25 = vmul.f32 %v260_v11, %v260_v11 }
  0xe8   : > { %v247_v14 = vpop.f32.mrb[3].mxu0  ;;  %v263_v15 = vpop.f32.mrb[3].mxu1  ;;  %v291_v22 = vmul.f32 %v422_v12, %v422_v12  ;;  %v295_v34 = vmul.f32 %v426_v13, %v426_v13 }
  0xe9   : > { %v275_v17 = vadd.f32 %v247_v14, %v244_v10  ;;  %v289_v18 = vmul.f32 %v247_v14, %v247_v14  ;;  %v293_v30 = vmul.f32 %v263_v15, %v263_v15 }
  0xeb   : > { %v276_v20 = vadd.f32 %v421_v8, %v275_v17  ;;  %v296_v21 = vadd.f32 %v289_v18, %v288_v16 }
  0xed   : > { %v297_v23 = vadd.f32 %v296_v21, %v290_v19  ;;  %v277_v24 = vadd.f32 %v422_v12, %v276_v20 }
  0xef   : > { %v278_v26 = vadd.f32 %v277_v24, %v260_v11  ;;  %v298_v27 = vadd.f32 %v297_v23, %v291_v22 }
  0xf1   : > { %v299_v28 = vadd.f32 %v298_v27, %v292_v25  ;;  %v279_v29 = vadd.f32 %v278_v26, %v263_v15 }
  0xf3   : > { %v280_v32 = vadd.f32 %v425_v9, %v279_v29  ;;  %v300_v33 = vadd.f32 %v299_v28, %v293_v30 }
  0xf5   : > { %v281_v35 = vadd.f32 %v426_v13, %v280_v32  ;;  %v301_v36 = vadd.f32 %v300_v33, %v294_v31 }
  0xf7   : > { %v282_v37 = vrot.slane %v281_v35, 4  ;;  %v302_v38 = vadd.f32 %v301_v36, %v295_v34 }
  0xf9   : > { %v283_v39 = vadd.f32 %v282_v37, %v281_v35  ;;  %v303_v40 = vrot.slane %v302_v38, 4 }
  0xfb   : > { %v284_v41 = vrot.slane %v283_v39, 2  ;;  %v304_v42 = vadd.f32 %v303_v40, %v302_v38 }
  0xfd   : > { %v285_v46 = vadd.f32 %v284_v41, %v283_v39  ;;  %v305_v47 = vrot.slane %v304_v42, 2 }
  0xff   : > { %v286_v48 = vrot.slane %v285_v46, 1  ;;  %v306_v49 = vadd.f32 %v305_v47, %v304_v42 }
 0x101   : > { %v307_v52 = vrot.slane %v306_v49, 1  ;;  %v287_v53 = vadd.f32 %v286_v48, %v285_v46 }
 0x103   : > { %v308_v54 = vadd.f32 %v307_v52, %v306_v49 }
 0x105   : > { %v311_v56 = vcombine.low %v287_v53, %v308_v54 }
 0x107   : > { %v318_v57 = vrot.slane %v311_v56, %v317_v55 }
 0x109   : > { %v325_v58 = vrot.slane %v318_v57, %v317_v55 }
 0x10b   : > { %331 = vst.msk [vmem:[%s143_s25] sm:$0x3] %vm329_vm2, %v325_v58 }
 0x10c PF: > { %s12_s9 = sadd.s32 1, %s457_s9  }
 0x10d   : > { %p9_p5 = scmp.ge.s32.totalorder %s12_s9, 4  }
 0x10f   :  { %11 = sbr.rel (!%p9_p5) target bundleno = 1 (0x1), region = 58 }

// kernel: conv_bn_relu.3
= control target key start
LH: loop header
LB: loop body
LE: loop exit
PB: predicated region body
PF: predicated region fallthrough
CT: control target
= control target key end

     0   :  { %s536_s15 = smov 0   ;;  %s580_s0 = inlined_call_operand.vmem [shape: bf16[128,36], index: 0, kind: input, shape index: {}]   ;;  %s581_s1 = inlined_call_operand.vmem [shape: bf16[36,128], index: 1, kind: input, shape index: {}]   ;;  %s582_s2 = inlined_call_operand.vmem [shape: f32[1,128], index: 2, kind: input, shape index: {}]   ;;  %s583_s3 = inlined_call_operand.vmem [shape: f32[1,128], index: 3, kind: input, shape index: {}]   ;;  %s584_s4 = inlined_call_operand.vmem [shape: f32[128,8], index: 4, kind: output, shape index: {}]  }
   0x1 LB: > { %s435_s16 = sadd.s32 4294967295, %s509_s15   ;;  %p439_p0 = scmp.ge.s32.totalorder %s509_s15, 1  ;;  %s509_s15 = sphi %s536_s15, %s14_s15  }
   0x2   : > { %p163_p1 = scmp.lt.s32.totalorder %s509_s15, 3 }
   0x4   : > { %p164_p2 = pnand %p439_p0, %p163_p1 }
   0x5   : > { %v496_v0 = vld [vmem:[%s581_s1] sm:$0xff] (!%p164_p2)   ;;  %v497_v1 = vld [vmem:[%s581_s1 + $0x8] sm:$0xff] (!%p164_p2)   ;;  %s440_s21 = sshll.u32 (!%p164_p2), %s435_s16, 3  ;;  %v498_v2 = vld [vmem:[%s581_s1 + $0x10] ss:$0 sps:$4 sm:$0x33] (!%p164_p2)  }
   0x6   : > { %167 = sbr.rel (%p164_p2) target bundleno = 240 (0xf0), region = 36  ;;  %466 = vmatprep.subr.bf16.mxu0 (!%p164_p2), %v496_v0  ;;  %480 = vmatprep.subr.bf16.mxu1 (!%p164_p2), %v496_v0  ;;  %p190_p3 = scmp.lt.s32.totalorder (!%p164_p2), %s440_s21, 15  ;;  %vm263_vm0 = vcmask (!%p164_p2), 1041408   ;;  %vm250_vm1 = vcmask (!%p164_p2), 293888   ;;  %v455_v8 = vld [vmem:[%s582_s2] ss:$0 sm:$0xff] (!%p164_p2) }
   0x7   : > { %467 = vmatpush3.bf16.msra.mxu0 (!%p164_p2), %v496_v0  ;;  %483 = vmatpush3.bf16.msra.mxu1 (!%p164_p2), %v496_v0  ;;  %v265_v3 = vsel (!%p164_p2), %vm263_vm0, %v498_v2, 0  ;;  %v456_v10 = vld [vmem:[%s583_s3] ss:$0 sm:$0xff] (!%p164_p2)  ;;  %vm370_vm2 = vcmask (!%p164_p2), 64512  }
   0x8   : > { %468 = vmatprep.subr.bf16.mxu0 (!%p164_p2), %v497_v1  ;;  %481 = vmatprep.subr.bf16.mxu1 (!%p164_p2), %v497_v1 }
   0xb   : > { %469 = vmatpush3.bf16.msra.mxu0 (!%p164_p2), %v497_v1  ;;  %484 = vmatpush3.bf16.msra.mxu1 (!%p164_p2), %v497_v1 }
   0xc   : > { %486 = vmatprep.subr.msk.bf16.mxu0 (!%p164_p2), %vm263_vm0, %v498_v2  ;;  %487 = vmatprep.subr.msk.bf16.mxu1 (!%p164_p2), %vm263_vm0, %v498_v2 }
   0xd   : > { %s586_s21 = smov (!%p190_p3, %s440_s21), 15 }
   0xe   : > { %s441_s24 = sshll.u32 %s586_s21, 2  ;;  %s443_s6 = sshll.u32 %s586_s21, 3 }
   0xf   : > { %s193_s27 = scalar_lea.vmem %s580_s0, %s441_s24  ;;  %471 = vmatpush3.bf16.msra.mxu0 %v265_v3  ;;  %485 = vmatpush3.bf16.msra.mxu1 %v265_v3  ;;  %s199_s9 = scalar_lea.vmem %s584_s4, %s443_s6 }
  0x10   : > { %v499_v4 = vld [vmem:[%s193_s27] sm:$0xff]   ;;  %v500_v5 = vld [vmem:[%s193_s27 + $0x10] sm:$0xff]   ;;  %v501_v6 = vld [vmem:[%s193_s27 + $0x8] sm:$0xff]  }
  0x11   : > { %472 = vmatprep.mubr.msk.bf16.mxu0 %vm250_vm1, %v499_v4  ;;  %v502_v7 = vld [vmem:[%s193_s27 + $0x18] sm:$0xff]   ;;  %476 = vmatprep.mubr.msk.bf16.mxu1 %vm250_vm1, %v500_v5 }
  0x12   : > { %473 = vmatmul.mubr.msk.bf16.vlgmr.msra.gmra.mrb[0].mxu0 %vm250_vm1, %v501_v6  ;;  %477 = vmatmul.mubr.msk.bf16.vlgmr.msra.gmra.mrb[0].mxu1 %vm250_vm1, %v502_v7 }
  0xe5   : > { %v474_v9 = vpop.f32.mrb[0].mxu0  ;;  %v478_v11 = vpop.f32.mrb[0].mxu1 }
  0xe6   : > { %v341_v12 = vmul.f32 %v474_v9, %v455_v8  ;;  %v345_v13 = vmul.f32 %v478_v11, %v455_v8  ;;  %v301_v14 = vpop.f32.mrb[1].mxu0  ;;  %v317_v15 = vpop.f32.mrb[1].mxu1 }
  0xe7   : > { %v339_v16 = vmul.f32 %v455_v8, %v301_v14  ;;  %v343_v17 = vmul.f32 %v455_v8, %v317_v15  ;;  %v475_v18 = vpop.f32.mrb[2].mxu0  ;;  %v479_v19 = vpop.f32.mrb[2].mxu1 }
  0xe8   : > { %v356_v20 = vadd.f32 %v456_v10, %v341_v12  ;;  %v360_v21 = vadd.f32 %v456_v10, %v345_v13  ;;  %v342_v22 = vmul.f32 %v475_v18, %v455_v8  ;;  %v346_v23 = vmul.f32 %v479_v19, %v455_v8  ;;  %v304_v24 = vpop.f32.mrb[3].mxu0  ;;  %v320_v25 = vpop.f32.mrb[3].mxu1 }
  0xe9   : > { %v354_v26 = vadd.f32 %v456_v10, %v339_v16  ;;  %v358_v27 = vadd.f32 %v456_v10, %v343_v17  ;;  %v340_v28 = vmul.f32 %v455_v8, %v304_v24  ;;  %v344_v29 = vmul.f32 %v455_v8, %v320_v25 }
  0xea   : > { %v364_v30 = vmax.f32 %v356_v20, 0.0  ;;  %v368_v31 = vmax.f32 %v360_v21, 0.0  ;;  %v357_v32 = vadd.f32 %v456_v10, %v342_v22  ;;  %v361_v33 = vadd.f32 %v456_v10, %v346_v23 }
  0xeb   : > { %v362_v34 = vmax.f32 %v354_v26, 0.0  ;;  %v366_v35 = vmax.f32 %v358_v27, 0.0  ;;  %v355_v36 = vadd.f32 %v456_v10, %v340_v28  ;;  %v359_v37 = vadd.f32 %v456_v10, %v344_v29 }
  0xec   : > { %373 = vst.msk [vmem:[%s199_s9 + $0x10] sm:$0xff] %vm370_vm2, %v364_v30  ;;  %377 = vst.msk [vmem:[%s199_s9 + $0x30] sm:$0xff] %vm370_vm2, %v368_v31  ;;  %v365_v38 = vmax.f32 %v357_v32, 0.0  ;;  %v369_v39 = vmax.f32 %v361_v33, 0.0 }
  0xed   : > { %371 = vst.msk [vmem:[%s199_s9] sm:$0xff] %vm370_vm2, %v362_v34  ;;  %375 = vst.msk [vmem:[%s199_s9 + $0x20] sm:$0xff] %vm370_vm2, %v366_v35  ;;  %v363_v40 = vmax.f32 %v355_v36, 0.0  ;;  %v367_v41 = vmax.f32 %v359_v37, 0.0 }
  0xee   : > { %374 = vst.msk [vmem:[%s199_s9 + $0x18] sm:$0xff] %vm370_vm2, %v365_v38  ;;  %378 = vst.msk [vmem:[%s199_s9 + $0x38] sm:$0xff] %vm370_vm2, %v369_v39 }
  0xef   : > { %372 = vst.msk [vmem:[%s199_s9 + $0x8] sm:$0xff] %vm370_vm2, %v363_v40  ;;  %376 = vst.msk [vmem:[%s199_s9 + $0x28] sm:$0xff] %vm370_vm2, %v367_v41 }
  0xf0 PF: > { %s14_s15 = sadd.s32 1, %s509_s15  }
  0xf1   : > { %p11_p4 = scmp.ge.s32.totalorder %s14_s15, 4  }
  0xf3   :  { %13 = sbr.rel (!%p11_p4) target bundleno = 1 (0x1), region = 66 }

</bundles_post_ra>
